<compile_context>
chip_gen: v5e
topology: v5e:2x2
jax: 0.10.0
libtpu: 0.0.40
codegen_flags: <defaults>
</compile_context>

<pallas_src>
import math
import functools

import jax
import jax.numpy as jnp
import numpy as np
from jax import lax
from jax.experimental import pallas as pl
from jax.experimental.pallas import tpu as pltpu

NEG_MIN = float(jnp.finfo(jnp.float32).min)   # used by the reference only
MASK_BIAS = -1e30                             # large-but-finite additive mask

_MXU_WEIGHTS = ("wq", "wk", "wv", "wo", "w1", "w2")


# ---------- elementwise helpers used inside the kernel ----------------------

def _gelu_tanh(x):
    # tanh-form GELU: a single EUP transcendental per element (the erf
    # polynomial needs exp + a true divide).  |gelu_tanh - gelu_exact| < ~1e-3.
    c = 0.7978845608028654  # sqrt(2/pi)
    return 0.5 * x * (1.0 + jnp.tanh(c * (x + 0.044715 * x * x * x)))


def _layer_norm(v, g, b, eps=1e-12):
    mu = jnp.mean(v, axis=-1, keepdims=True)
    c = v - mu
    var = jnp.mean(c * c, axis=-1, keepdims=True)
    return c * lax.rsqrt(var + eps) * g + b


# ---------------------------- the Pallas kernel ------------------------------

def _block_kernel(n_heads,
                  x_ref, bias_ref,
                  wqkv_ref, bqkv_ref, wo_ref, bo_ref,
                  g1_ref, be1_ref, w1_ref, b1_ref, w2_ref, b2_ref,
                  g2_ref, be2_ref,
                  o_ref, ctx_scr):
    x = x_ref[0]            # (S, D) f32 (residual path stays f32)
    bias = bias_ref[0]      # (1, S) f32 additive mask: 0 attend / -1e30 masked
    S, D = x.shape
    dh = D // n_heads

    x_bf = x.astype(jnp.bfloat16)

    # ---- fused q/k/v projection: one wide bf16 MXU matmul, f32 accumulate ----
    # (the 1/sqrt(dh) query scaling is already folded into the q-part of
    # wqkv / bqkv at one-time parameter prep)
    qkv = jnp.dot(x_bf, wqkv_ref[...],
                  preferred_element_type=jnp.float32) + bqkv_ref[...]   # (S, 3D)

    # ---- per-head scaled-dot-product attention --------------------------------
    # Contexts are written into an (S, D) VMEM scratch at static lane offsets
    # (no concatenate); softmax normalisation is applied after the p @ v matmul.
    for h in range(n_heads):
        lo = h * dh
        qh = qkv[:, lo:lo + dh].astype(jnp.bfloat16)
        kh = qkv[:, D + lo:D + lo + dh].astype(jnp.bfloat16)
        vh = qkv[:, 2 * D + lo:2 * D + lo + dh].astype(jnp.bfloat16)

        s = lax.dot_general(qh, kh, (((1,), (1,)), ((), ())),
                            preferred_element_type=jnp.float32)          # (S, S)
        s = s + bias                                                      # masked keys
        m = jnp.max(s, axis=-1, keepdims=True)
        e = jnp.exp(s - m)
        l = jnp.sum(e, axis=-1, keepdims=True)
        ctx_h = jnp.dot(e.astype(jnp.bfloat16), vh,
                        preferred_element_type=jnp.float32)               # (S, dh)
        ctx_scr[:, lo:lo + dh] = ctx_h * pl.reciprocal(l, approx=True)

    # ---- output projection (full-width) + residual + LayerNorm (eps=1e-12) ----
    ctx = ctx_scr[...].astype(jnp.bfloat16)
    attn = jnp.dot(ctx, wo_ref[...], preferred_element_type=jnp.float32) + bo_ref[...]
    sa = _layer_norm(attn + x, g1_ref[...], be1_ref[...])

    # ---- FFN: lin1 -> gelu -> lin2, residual + LayerNorm ----
    h1 = _gelu_tanh(jnp.dot(sa.astype(jnp.bfloat16), w1_ref[...],
                            preferred_element_type=jnp.float32) + b1_ref[...])
    ffn = jnp.dot(h1.astype(jnp.bfloat16), w2_ref[...],
                  preferred_element_type=jnp.float32) + b2_ref[...]
    o_ref[0] = _layer_norm(ffn + sa, g2_ref[...], be2_ref[...]).astype(o_ref.dtype)


# ------------------------- one-time parameter prep ----------------------------

def prepare_params(params):
    """One-time prep (NOT per-call work): fold 1/sqrt(d_head) into the q
    projection, fuse wq|wk|wv into a single (D, 3D) bf16 weight, and cast the
    remaining matmul weights to bf16 (f32 accumulation happens in-kernel).
    Biases and LayerNorm parameters stay f32."""
    d_model = params["wq"].shape[0]
    dh = d_model // params["n_heads"]
    scale = 1.0 / math.sqrt(dh)

    wq = params["wq"] * scale
    bq = params["bq"] * scale
    p = dict(
        n_heads=params["n_heads"],
        wqkv=jnp.concatenate([wq, params["wk"], params["wv"]],
                             axis=1).astype(jnp.bfloat16),
        bqkv=jnp.concatenate([bq, params["bk"], params["bv"]],
                             axis=1).astype(jnp.float32),
        wo=params["wo"].astype(jnp.bfloat16), bo=params["bo"],
        ln1_g=params["ln1_g"], ln1_b=params["ln1_b"],
        w1=params["w1"].astype(jnp.bfloat16), b1=params["b1"],
        w2=params["w2"].astype(jnp.bfloat16), b2=params["b2"],
        ln2_g=params["ln2_g"], ln2_b=params["ln2_b"],
    )
    return p


# ------------------------------- wrapper --------------------------------------

def transformer_block_pallas(x, attn_mask, params):
    """`params` must come from prepare_params()."""
    B, S, D = x.shape
    H = params["n_heads"]
    assert D % H == 0

    # Additive attention bias: 0 where attended, -1e30 where masked out.
    bias = jnp.where(attn_mask == 0, MASK_BIAS, 0.0).astype(jnp.float32)
    bias = bias.reshape(B, 1, S)

    weight_args = (params["wqkv"], params["bqkv"], params["wo"], params["bo"],
                   params["ln1_g"], params["ln1_b"], params["w1"], params["b1"],
                   params["w2"], params["b2"], params["ln2_g"], params["ln2_b"])

    def rep(shape):
        # Replicated (constant-index) operand: full array as one block.  The
        # pipeline only DMAs it once because the block index never changes.
        # TODO(synk): add pipeline_mode=pl.Buffered(1) (single-buffered weights)
        # and a parallel query-tile grid axis when targeting v7x (64 MiB VMEM)
        # at full DistilBERT sizes (S=512, D=768, d_mlp=3072).
        return pl.BlockSpec(shape, lambda b, n=len(shape): (0,) * n)

    weight_specs = [rep(w.shape) for w in weight_args]
    kernel = functools.partial(_block_kernel, H)

    return pl.pallas_call(
        kernel,
        out_shape=jax.ShapeDtypeStruct((B, S, D), x.dtype),
        grid_spec=pltpu.PrefetchScalarGridSpec(
            num_scalar_prefetch=0,
            grid=(B,),
            in_specs=[pl.BlockSpec((1, S, D), lambda b: (b, 0, 0)),
                      pl.BlockSpec((1, 1, S), lambda b: (b, 0, 0))] + weight_specs,
            out_specs=pl.BlockSpec((1, S, D), lambda b: (b, 0, 0)),
            scratch_shapes=[pltpu.VMEM((S, D), jnp.float32)],
        ),
        compiler_params=pltpu.CompilerParams(
            dimension_semantics=("parallel",),
            vmem_limit_bytes=64 * 1024 * 1024,
        ),
    )(x, bias, *weight_args)


# --------------------------- plain-JAX reference ------------------------------

def transformer_block_ref(x, mask, p):
    """f32 reference implementing the torch forward exactly (exact GELU,
    masked_fill with finfo.min, explicit q / sqrt(dh))."""
    B, S, D = x.shape
    H = p["n_heads"]
    dh = D // H

    def lin(t, w, b):
        return jnp.einsum("bsd,de->bse", t, w, precision="highest") + b

    q, k, v = lin(x, p["wq"], p["bq"]), lin(x, p["wk"], p["bk"]), lin(x, p["wv"], p["bv"])

    def split(t):
        return t.reshape(B, S, H, dh).transpose(0, 2, 1, 3)

    q = split(q) / math.sqrt(dh)
    k = split(k)
    v = split(v)
    scores = jnp.einsum("bhqd,bhkd->bhqk", q, k, precision="highest")
    maskb = (mask == 0).reshape(B, 1, 1, S)
    scores = jnp.where(maskb, NEG_MIN, scores)
    w = jax.nn.softmax(scores, axis=-1)
    ctx = jnp.einsum("bhqk,bhkd->bhqd", w, v,
                     precision="highest").transpose(0, 2, 1, 3).reshape(B, S, D)
    attn = lin(ctx, p["wo"], p["bo"])

    def ln(t, g, b):
        mu = t.mean(-1, keepdims=True)
        var = ((t - mu) ** 2).mean(-1, keepdims=True)
        return (t - mu) / jnp.sqrt(var + 1e-12) * g + b

    sa = ln(attn + x, p["ln1_g"], p["ln1_b"])
    h = jax.nn.gelu(lin(sa, p["w1"], p["b1"]), approximate=False)
    ffn = lin(h, p["w2"], p["b2"])
    return ln(ffn + sa, p["ln2_g"], p["ln2_b"])


# ------------------------------ parameter init --------------------------------

def init_params(key, d_model, n_heads, d_mlp):
    def linear(k, fan_in, fan_out):
        kw, kb = jax.random.split(k)
        w = jax.random.normal(kw, (fan_in, fan_out), jnp.float32) * 0.05
        b = jax.random.normal(kb, (1, fan_out), jnp.float32) * 0.05
        return w, b

    keys = jax.random.split(key, 6)
    wq, bq = linear(keys[0], d_model, d_model)
    wk, bk = linear(keys[1], d_model, d_model)
    wv, bv = linear(keys[2], d_model, d_model)
    wo, bo = linear(keys[3], d_model, d_model)
    w1, b1 = linear(keys[4], d_model, d_mlp)
    w2, b2 = linear(keys[5], d_mlp, d_model)
    return dict(
        n_heads=n_heads,
        wq=wq, bq=bq, wk=wk, bk=bk, wv=wv, bv=bv, wo=wo, bo=bo,
        ln1_g=jnp.ones((1, d_model), jnp.float32),
        ln1_b=jnp.zeros((1, d_model), jnp.float32),
        w1=w1, b1=b1, w2=w2, b2=b2,
        ln2_g=jnp.ones((1, d_model), jnp.float32),
        ln2_b=jnp.zeros((1, d_model), jnp.float32),
    )


def _round_weights_to_bf16(params):
    # Round matmul weights through bf16 (keeping f32 dtype) so the kernel and
    # the f32 reference see identical weights; remaining differences are the
    # in-kernel numerics (bf16 activations, approx reciprocal, tanh-GELU).
    p = dict(params)
    for key in _MXU_WEIGHTS:
        p[key] = p[key].astype(jnp.bfloat16).astype(jnp.float32)
    return p


# ---------------------------------- main ---------------------------------------

if __name__ == "__main__":
    # Small test shapes; tune/benchmark at realistic sizes (S=512, D=768, H=12,
    # d_mlp=3072) — conclusions at this toy config do not transfer.
    B, S, D, H, D_MLP = 2, 8, 32, 4, 64   # d_model % n_heads == 0

    key = jax.random.PRNGKey(0)
    k_x, k_p = jax.random.split(key)
    x = jax.random.normal(k_x, (B, S, D), jnp.float32)
    # attention mask (bs, seq): 1 = attend, 0 = masked out
    attn_mask = jnp.array([[1, 1, 1, 1, 1, 1, 0, 0],
                           [1, 1, 1, 1, 1, 1, 1, 1]], dtype=jnp.float32)

    params = init_params(k_p, D, H, D_MLP)
    params_q = _round_weights_to_bf16(params)
    prepared = prepare_params(params_q)      # one-time prep, outside the call

    out = jax.block_until_ready(transformer_block_pallas(x, attn_mask, prepared))
    ref = jax.block_until_ready(transformer_block_ref(x, attn_mask, params_q))
    np.testing.assert_allclose(np.asarray(out), np.asarray(ref), rtol=2e-2, atol=2e-2)

    print("KERNEL_OK")
</pallas_src>

<mosaic_0001>
module attributes {stable_mosaic.version = 11 : i64} {
  func.func @_block_kernel(%arg0: i32, %arg1: memref<1x8x32xf32, #tpu.memory_space<vmem>>, %arg2: memref<1x1x8xf32, #tpu.memory_space<vmem>>, %arg3: memref<32x96xbf16, #tpu.memory_space<vmem>>, %arg4: memref<1x96xf32, #tpu.memory_space<vmem>>, %arg5: memref<32x32xbf16, #tpu.memory_space<vmem>>, %arg6: memref<1x32xf32, #tpu.memory_space<vmem>>, %arg7: memref<1x32xf32, #tpu.memory_space<vmem>>, %arg8: memref<1x32xf32, #tpu.memory_space<vmem>>, %arg9: memref<32x64xbf16, #tpu.memory_space<vmem>>, %arg10: memref<1x64xf32, #tpu.memory_space<vmem>>, %arg11: memref<64x32xbf16, #tpu.memory_space<vmem>>, %arg12: memref<1x32xf32, #tpu.memory_space<vmem>>, %arg13: memref<1x32xf32, #tpu.memory_space<vmem>>, %arg14: memref<1x32xf32, #tpu.memory_space<vmem>>, %arg15: memref<1x8x32xf32, #tpu.memory_space<vmem>>, %arg16: memref<8x32xf32, #tpu.memory_space<vmem>>) attributes {dimension_semantics = [#tpu.dimension_semantics<parallel>], iteration_bounds = array<i64: 2>, scalar_prefetch = 0 : i64, scratch_operands = 1 : i64, tpu.core_type = #tpu.core_type<tc>, window_params = [{transform_indices = @transform_0, window_bounds = array<i64: 1, 8, 32>}, {transform_indices = @transform_1, window_bounds = array<i64: 1, 1, 8>}, {pipeline_mode = #tpu.pipeline_mode<synchronous>, transform_indices = @transform_2, window_bounds = array<i64: 32, 96>}, {pipeline_mode = #tpu.pipeline_mode<synchronous>, transform_indices = @transform_3, window_bounds = array<i64: 1, 96>}, {pipeline_mode = #tpu.pipeline_mode<synchronous>, transform_indices = @transform_4, window_bounds = array<i64: 32, 32>}, {pipeline_mode = #tpu.pipeline_mode<synchronous>, transform_indices = @transform_5, window_bounds = array<i64: 1, 32>}, {pipeline_mode = #tpu.pipeline_mode<synchronous>, transform_indices = @transform_6, window_bounds = array<i64: 1, 32>}, {pipeline_mode = #tpu.pipeline_mode<synchronous>, transform_indices = @transform_7, window_bounds = array<i64: 1, 32>}, {pipeline_mode = #tpu.pipeline_mode<synchronous>, transform_indices = @transform_8, window_bounds = array<i64: 32, 64>}, {pipeline_mode = #tpu.pipeline_mode<synchronous>, transform_indices = @transform_9, window_bounds = array<i64: 1, 64>}, {pipeline_mode = #tpu.pipeline_mode<synchronous>, transform_indices = @transform_10, window_bounds = array<i64: 64, 32>}, {pipeline_mode = #tpu.pipeline_mode<synchronous>, transform_indices = @transform_11, window_bounds = array<i64: 1, 32>}, {pipeline_mode = #tpu.pipeline_mode<synchronous>, transform_indices = @transform_12, window_bounds = array<i64: 1, 32>}, {pipeline_mode = #tpu.pipeline_mode<synchronous>, transform_indices = @transform_13, window_bounds = array<i64: 1, 32>}, {transform_indices = @transform_14, window_bounds = array<i64: 1, 8, 32>}]} {
    %c0 = arith.constant 0 : index
    %c0_0 = arith.constant 0 : index
    %c0_1 = arith.constant 0 : index
    %0 = vector.load %arg1[%c0, %c0_0, %c0_1] : memref<1x8x32xf32, #tpu.memory_space<vmem>>, vector<1x8x32xf32>
    %1 = vector.shape_cast %0 : vector<1x8x32xf32> to vector<8x32xf32>
    %c0_2 = arith.constant 0 : index
    %c0_3 = arith.constant 0 : index
    %c0_4 = arith.constant 0 : index
    %2 = vector.load %arg2[%c0_2, %c0_3, %c0_4] : memref<1x1x8xf32, #tpu.memory_space<vmem>>, vector<1x1x8xf32>
    %3 = vector.shape_cast %2 : vector<1x1x8xf32> to vector<1x8xf32>
    %4 = arith.truncf %1 : vector<8x32xf32> to vector<8x32xbf16>
    %c0_5 = arith.constant 0 : index
    %c0_6 = arith.constant 0 : index
    %5 = vector.load %arg3[%c0_5, %c0_6] : memref<32x96xbf16, #tpu.memory_space<vmem>>, vector<32x96xbf16>
    %cst = arith.constant dense<0.000000e+00> : vector<8x96xf32>
    %6 = tpu.matmul %4, %5, %cst {dimension_numbers = #tpu.dot_dimension_numbers<[1], [0], [0], [1], [0, 0, 1, 1], [], []>} : vector<8x32xbf16>, vector<32x96xbf16>, vector<8x96xf32> -> vector<8x96xf32>
    %c0_7 = arith.constant 0 : index
    %c0_8 = arith.constant 0 : index
    %7 = vector.load %arg4[%c0_7, %c0_8] : memref<1x96xf32, #tpu.memory_space<vmem>>, vector<1x96xf32>
    %8 = vector.broadcast %7 : vector<1x96xf32> to vector<8x96xf32>
    %9 = arith.addf %6, %8 : vector<8x96xf32>
    %10 = vector.extract_strided_slice %9 {offsets = [0, 0], sizes = [8, 8], strides = [1, 1]} : vector<8x96xf32> to vector<8x8xf32>
    %11 = arith.truncf %10 : vector<8x8xf32> to vector<8x8xbf16>
    %12 = vector.extract_strided_slice %9 {offsets = [0, 32], sizes = [8, 8], strides = [1, 1]} : vector<8x96xf32> to vector<8x8xf32>
    %13 = arith.truncf %12 : vector<8x8xf32> to vector<8x8xbf16>
    %14 = vector.extract_strided_slice %9 {offsets = [0, 64], sizes = [8, 8], strides = [1, 1]} : vector<8x96xf32> to vector<8x8xf32>
    %15 = arith.truncf %14 : vector<8x8xf32> to vector<8x8xbf16>
    %cst_9 = arith.constant dense<0.000000e+00> : vector<8x8xf32>
    %16 = tpu.matmul %11, %13, %cst_9 {dimension_numbers = #tpu.dot_dimension_numbers<[1], [1], [0], [0], [0, 0, 1, 0], [], []>} : vector<8x8xbf16>, vector<8x8xbf16>, vector<8x8xf32> -> vector<8x8xf32>
    %17 = vector.broadcast %3 : vector<1x8xf32> to vector<8x8xf32>
    %18 = arith.addf %16, %17 : vector<8x8xf32>
    %cst_10 = arith.constant dense<0xFF800000> : vector<8xf32>
    %19 = vector.multi_reduction <maximumf>, %18, %cst_10 [1] : vector<8x8xf32> to vector<8xf32>
    %20 = vector.shape_cast %19 : vector<8xf32> to vector<8x1xf32>
    %21 = vector.broadcast %20 : vector<8x1xf32> to vector<8x8xf32>
    %22 = arith.subf %18, %21 : vector<8x8xf32>
    %23 = math.exp %22 : vector<8x8xf32>
    %cst_11 = arith.constant dense<0.000000e+00> : vector<8xf32>
    %24 = vector.multi_reduction <add>, %23, %cst_11 [1] : vector<8x8xf32> to vector<8xf32>
    %25 = vector.shape_cast %24 : vector<8xf32> to vector<8x1xf32>
    %26 = arith.truncf %23 : vector<8x8xf32> to vector<8x8xbf16>
    %cst_12 = arith.constant dense<0.000000e+00> : vector<8x8xf32>
    %27 = tpu.matmul %26, %15, %cst_12 {dimension_numbers = #tpu.dot_dimension_numbers<[1], [0], [0], [1], [0, 0, 1, 1], [], []>} : vector<8x8xbf16>, vector<8x8xbf16>, vector<8x8xf32> -> vector<8x8xf32>
    %28 = tpu.reciprocal %25 {approx = true} : vector<8x1xf32> -> vector<8x1xf32>
    %29 = vector.broadcast %28 : vector<8x1xf32> to vector<8x8xf32>
    %30 = arith.mulf %27, %29 : vector<8x8xf32>
    %c0_13 = arith.constant 0 : index
    %c0_14 = arith.constant 0 : index
    %31 = vector.load %arg16[%c0_13, %c0_14] : memref<8x32xf32, #tpu.memory_space<vmem>>, vector<8x8xf32>
    tpu.vector_store %arg16[%c0_13, %c0_14], %30 {strides = array<i32>} : memref<8x32xf32, #tpu.memory_space<vmem>>, vector<8x8xf32>,
    %32 = vector.extract_strided_slice %9 {offsets = [0, 8], sizes = [8, 8], strides = [1, 1]} : vector<8x96xf32> to vector<8x8xf32>
    %33 = arith.truncf %32 : vector<8x8xf32> to vector<8x8xbf16>
    %34 = vector.extract_strided_slice %9 {offsets = [0, 40], sizes = [8, 8], strides = [1, 1]} : vector<8x96xf32> to vector<8x8xf32>
    %35 = arith.truncf %34 : vector<8x8xf32> to vector<8x8xbf16>
    %36 = vector.extract_strided_slice %9 {offsets = [0, 72], sizes = [8, 8], strides = [1, 1]} : vector<8x96xf32> to vector<8x8xf32>
    %37 = arith.truncf %36 : vector<8x8xf32> to vector<8x8xbf16>
    %cst_15 = arith.constant dense<0.000000e+00> : vector<8x8xf32>
    %38 = tpu.matmul %33, %35, %cst_15 {dimension_numbers = #tpu.dot_dimension_numbers<[1], [1], [0], [0], [0, 0, 1, 0], [], []>} : vector<8x8xbf16>, vector<8x8xbf16>, vector<8x8xf32> -> vector<8x8xf32>
    %39 = vector.broadcast %3 : vector<1x8xf32> to vector<8x8xf32>
    %40 = arith.addf %38, %39 : vector<8x8xf32>
    %cst_16 = arith.constant dense<0xFF800000> : vector<8xf32>
    %41 = vector.multi_reduction <maximumf>, %40, %cst_16 [1] : vector<8x8xf32> to vector<8xf32>
    %42 = vector.shape_cast %41 : vector<8xf32> to vector<8x1xf32>
    %43 = vector.broadcast %42 : vector<8x1xf32> to vector<8x8xf32>
    %44 = arith.subf %40, %43 : vector<8x8xf32>
    %45 = math.exp %44 : vector<8x8xf32>
    %cst_17 = arith.constant dense<0.000000e+00> : vector<8xf32>
    %46 = vector.multi_reduction <add>, %45, %cst_17 [1] : vector<8x8xf32> to vector<8xf32>
    %47 = vector.shape_cast %46 : vector<8xf32> to vector<8x1xf32>
    %48 = arith.truncf %45 : vector<8x8xf32> to vector<8x8xbf16>
    %cst_18 = arith.constant dense<0.000000e+00> : vector<8x8xf32>
    %49 = tpu.matmul %48, %37, %cst_18 {dimension_numbers = #tpu.dot_dimension_numbers<[1], [0], [0], [1], [0, 0, 1, 1], [], []>} : vector<8x8xbf16>, vector<8x8xbf16>, vector<8x8xf32> -> vector<8x8xf32>
    %50 = tpu.reciprocal %47 {approx = true} : vector<8x1xf32> -> vector<8x1xf32>
    %51 = vector.broadcast %50 : vector<8x1xf32> to vector<8x8xf32>
    %52 = arith.mulf %49, %51 : vector<8x8xf32>
    %c0_19 = arith.constant 0 : index
    %c8 = arith.constant 8 : index
    %53 = vector.load %arg16[%c0_19, %c8] : memref<8x32xf32, #tpu.memory_space<vmem>>, vector<8x8xf32>
    tpu.vector_store %arg16[%c0_19, %c8], %52 {strides = array<i32>} : memref<8x32xf32, #tpu.memory_space<vmem>>, vector<8x8xf32>,
    %54 = vector.extract_strided_slice %9 {offsets = [0, 16], sizes = [8, 8], strides = [1, 1]} : vector<8x96xf32> to vector<8x8xf32>
    %55 = arith.truncf %54 : vector<8x8xf32> to vector<8x8xbf16>
    %56 = vector.extract_strided_slice %9 {offsets = [0, 48], sizes = [8, 8], strides = [1, 1]} : vector<8x96xf32> to vector<8x8xf32>
    %57 = arith.truncf %56 : vector<8x8xf32> to vector<8x8xbf16>
    %58 = vector.extract_strided_slice %9 {offsets = [0, 80], sizes = [8, 8], strides = [1, 1]} : vector<8x96xf32> to vector<8x8xf32>
    %59 = arith.truncf %58 : vector<8x8xf32> to vector<8x8xbf16>
    %cst_20 = arith.constant dense<0.000000e+00> : vector<8x8xf32>
    %60 = tpu.matmul %55, %57, %cst_20 {dimension_numbers = #tpu.dot_dimension_numbers<[1], [1], [0], [0], [0, 0, 1, 0], [], []>} : vector<8x8xbf16>, vector<8x8xbf16>, vector<8x8xf32> -> vector<8x8xf32>
    %61 = vector.broadcast %3 : vector<1x8xf32> to vector<8x8xf32>
    %62 = arith.addf %60, %61 : vector<8x8xf32>
    %cst_21 = arith.constant dense<0xFF800000> : vector<8xf32>
    %63 = vector.multi_reduction <maximumf>, %62, %cst_21 [1] : vector<8x8xf32> to vector<8xf32>
    %64 = vector.shape_cast %63 : vector<8xf32> to vector<8x1xf32>
    %65 = vector.broadcast %64 : vector<8x1xf32> to vector<8x8xf32>
    %66 = arith.subf %62, %65 : vector<8x8xf32>
    %67 = math.exp %66 : vector<8x8xf32>
    %cst_22 = arith.constant dense<0.000000e+00> : vector<8xf32>
    %68 = vector.multi_reduction <add>, %67, %cst_22 [1] : vector<8x8xf32> to vector<8xf32>
    %69 = vector.shape_cast %68 : vector<8xf32> to vector<8x1xf32>
    %70 = arith.truncf %67 : vector<8x8xf32> to vector<8x8xbf16>
    %cst_23 = arith.constant dense<0.000000e+00> : vector<8x8xf32>
    %71 = tpu.matmul %70, %59, %cst_23 {dimension_numbers = #tpu.dot_dimension_numbers<[1], [0], [0], [1], [0, 0, 1, 1], [], []>} : vector<8x8xbf16>, vector<8x8xbf16>, vector<8x8xf32> -> vector<8x8xf32>
    %72 = tpu.reciprocal %69 {approx = true} : vector<8x1xf32> -> vector<8x1xf32>
    %73 = vector.broadcast %72 : vector<8x1xf32> to vector<8x8xf32>
    %74 = arith.mulf %71, %73 : vector<8x8xf32>
    %c0_24 = arith.constant 0 : index
    %c16 = arith.constant 16 : index
    %75 = vector.load %arg16[%c0_24, %c16] : memref<8x32xf32, #tpu.memory_space<vmem>>, vector<8x8xf32>
    tpu.vector_store %arg16[%c0_24, %c16], %74 {strides = array<i32>} : memref<8x32xf32, #tpu.memory_space<vmem>>, vector<8x8xf32>,
    %76 = vector.extract_strided_slice %9 {offsets = [0, 24], sizes = [8, 8], strides = [1, 1]} : vector<8x96xf32> to vector<8x8xf32>
    %77 = arith.truncf %76 : vector<8x8xf32> to vector<8x8xbf16>
    %78 = vector.extract_strided_slice %9 {offsets = [0, 56], sizes = [8, 8], strides = [1, 1]} : vector<8x96xf32> to vector<8x8xf32>
    %79 = arith.truncf %78 : vector<8x8xf32> to vector<8x8xbf16>
    %80 = vector.extract_strided_slice %9 {offsets = [0, 88], sizes = [8, 8], strides = [1, 1]} : vector<8x96xf32> to vector<8x8xf32>
    %81 = arith.truncf %80 : vector<8x8xf32> to vector<8x8xbf16>
    %cst_25 = arith.constant dense<0.000000e+00> : vector<8x8xf32>
    %82 = tpu.matmul %77, %79, %cst_25 {dimension_numbers = #tpu.dot_dimension_numbers<[1], [1], [0], [0], [0, 0, 1, 0], [], []>} : vector<8x8xbf16>, vector<8x8xbf16>, vector<8x8xf32> -> vector<8x8xf32>
    %83 = vector.broadcast %3 : vector<1x8xf32> to vector<8x8xf32>
    %84 = arith.addf %82, %83 : vector<8x8xf32>
    %cst_26 = arith.constant dense<0xFF800000> : vector<8xf32>
    %85 = vector.multi_reduction <maximumf>, %84, %cst_26 [1] : vector<8x8xf32> to vector<8xf32>
    %86 = vector.shape_cast %85 : vector<8xf32> to vector<8x1xf32>
    %87 = vector.broadcast %86 : vector<8x1xf32> to vector<8x8xf32>
    %88 = arith.subf %84, %87 : vector<8x8xf32>
    %89 = math.exp %88 : vector<8x8xf32>
    %cst_27 = arith.constant dense<0.000000e+00> : vector<8xf32>
    %90 = vector.multi_reduction <add>, %89, %cst_27 [1] : vector<8x8xf32> to vector<8xf32>
    %91 = vector.shape_cast %90 : vector<8xf32> to vector<8x1xf32>
    %92 = arith.truncf %89 : vector<8x8xf32> to vector<8x8xbf16>
    %cst_28 = arith.constant dense<0.000000e+00> : vector<8x8xf32>
    %93 = tpu.matmul %92, %81, %cst_28 {dimension_numbers = #tpu.dot_dimension_numbers<[1], [0], [0], [1], [0, 0, 1, 1], [], []>} : vector<8x8xbf16>, vector<8x8xbf16>, vector<8x8xf32> -> vector<8x8xf32>
    %94 = tpu.reciprocal %91 {approx = true} : vector<8x1xf32> -> vector<8x1xf32>
    %95 = vector.broadcast %94 : vector<8x1xf32> to vector<8x8xf32>
    %96 = arith.mulf %93, %95 : vector<8x8xf32>
    %c0_29 = arith.constant 0 : index
    %c24 = arith.constant 24 : index
    %97 = vector.load %arg16[%c0_29, %c24] : memref<8x32xf32, #tpu.memory_space<vmem>>, vector<8x8xf32>
    tpu.vector_store %arg16[%c0_29, %c24], %96 {strides = array<i32>} : memref<8x32xf32, #tpu.memory_space<vmem>>, vector<8x8xf32>,
    %c0_30 = arith.constant 0 : index
    %c0_31 = arith.constant 0 : index
    %98 = vector.load %arg16[%c0_30, %c0_31] : memref<8x32xf32, #tpu.memory_space<vmem>>, vector<8x32xf32>
    %99 = arith.truncf %98 : vector<8x32xf32> to vector<8x32xbf16>
    %c0_32 = arith.constant 0 : index
    %c0_33 = arith.constant 0 : index
    %100 = vector.load %arg5[%c0_32, %c0_33] : memref<32x32xbf16, #tpu.memory_space<vmem>>, vector<32x32xbf16>
    %cst_34 = arith.constant dense<0.000000e+00> : vector<8x32xf32>
    %101 = tpu.matmul %99, %100, %cst_34 {dimension_numbers = #tpu.dot_dimension_numbers<[1], [0], [0], [1], [0, 0, 1, 1], [], []>} : vector<8x32xbf16>, vector<32x32xbf16>, vector<8x32xf32> -> vector<8x32xf32>
    %c0_35 = arith.constant 0 : index
    %c0_36 = arith.constant 0 : index
    %102 = vector.load %arg6[%c0_35, %c0_36] : memref<1x32xf32, #tpu.memory_space<vmem>>, vector<1x32xf32>
    %103 = vector.broadcast %102 : vector<1x32xf32> to vector<8x32xf32>
    %104 = arith.addf %101, %103 : vector<8x32xf32>
    %105 = arith.addf %104, %1 : vector<8x32xf32>
    %c0_37 = arith.constant 0 : index
    %c0_38 = arith.constant 0 : index
    %106 = vector.load %arg7[%c0_37, %c0_38] : memref<1x32xf32, #tpu.memory_space<vmem>>, vector<1x32xf32>
    %c0_39 = arith.constant 0 : index
    %c0_40 = arith.constant 0 : index
    %107 = vector.load %arg8[%c0_39, %c0_40] : memref<1x32xf32, #tpu.memory_space<vmem>>, vector<1x32xf32>
    %cst_41 = arith.constant dense<0.000000e+00> : vector<8xf32>
    %108 = vector.multi_reduction <add>, %105, %cst_41 [1] : vector<8x32xf32> to vector<8xf32>
    %109 = vector.shape_cast %108 : vector<8xf32> to vector<8x1xf32>
    %cst_42 = arith.constant 3.200000e+01 : f32
    %110 = vector.broadcast %cst_42 : f32 to vector<8x1xf32>
    %111 = arith.divf %109, %110 : vector<8x1xf32>
    %112 = vector.broadcast %111 : vector<8x1xf32> to vector<8x32xf32>
    %113 = arith.subf %105, %112 : vector<8x32xf32>
    %114 = arith.mulf %113, %113 : vector<8x32xf32>
    %cst_43 = arith.constant dense<0.000000e+00> : vector<8xf32>
    %115 = vector.multi_reduction <add>, %114, %cst_43 [1] : vector<8x32xf32> to vector<8xf32>
    %116 = vector.shape_cast %115 : vector<8xf32> to vector<8x1xf32>
    %cst_44 = arith.constant 3.200000e+01 : f32
    %117 = vector.broadcast %cst_44 : f32 to vector<8x1xf32>
    %118 = arith.divf %116, %117 : vector<8x1xf32>
    %cst_45 = arith.constant 9.99999996E-13 : f32
    %119 = vector.broadcast %cst_45 : f32 to vector<8x1xf32>
    %120 = arith.addf %118, %119 : vector<8x1xf32>
    %121 = math.rsqrt %120 : vector<8x1xf32>
    %122 = vector.broadcast %121 : vector<8x1xf32> to vector<8x32xf32>
    %123 = arith.mulf %113, %122 : vector<8x32xf32>
    %124 = vector.broadcast %106 : vector<1x32xf32> to vector<8x32xf32>
    %125 = arith.mulf %123, %124 : vector<8x32xf32>
    %126 = vector.broadcast %107 : vector<1x32xf32> to vector<8x32xf32>
    %127 = arith.addf %125, %126 : vector<8x32xf32>
    %128 = arith.truncf %127 : vector<8x32xf32> to vector<8x32xbf16>
    %c0_46 = arith.constant 0 : index
    %c0_47 = arith.constant 0 : index
    %129 = vector.load %arg9[%c0_46, %c0_47] : memref<32x64xbf16, #tpu.memory_space<vmem>>, vector<32x64xbf16>
    %cst_48 = arith.constant dense<0.000000e+00> : vector<8x64xf32>
    %130 = tpu.matmul %128, %129, %cst_48 {dimension_numbers = #tpu.dot_dimension_numbers<[1], [0], [0], [1], [0, 0, 1, 1], [], []>} : vector<8x32xbf16>, vector<32x64xbf16>, vector<8x64xf32> -> vector<8x64xf32>
    %c0_49 = arith.constant 0 : index
    %c0_50 = arith.constant 0 : index
    %131 = vector.load %arg10[%c0_49, %c0_50] : memref<1x64xf32, #tpu.memory_space<vmem>>, vector<1x64xf32>
    %132 = vector.broadcast %131 : vector<1x64xf32> to vector<8x64xf32>
    %133 = arith.addf %130, %132 : vector<8x64xf32>
    %cst_51 = arith.constant 5.000000e-01 : f32
    %134 = vector.broadcast %cst_51 : f32 to vector<8x64xf32>
    %135 = arith.mulf %134, %133 : vector<8x64xf32>
    %cst_52 = arith.constant 4.471500e-02 : f32
    %136 = vector.broadcast %cst_52 : f32 to vector<8x64xf32>
    %137 = arith.mulf %136, %133 : vector<8x64xf32>
    %138 = arith.mulf %137, %133 : vector<8x64xf32>
    %139 = arith.mulf %138, %133 : vector<8x64xf32>
    %140 = arith.addf %133, %139 : vector<8x64xf32>
    %cst_53 = arith.constant 0.797884583 : f32
    %141 = vector.broadcast %cst_53 : f32 to vector<8x64xf32>
    %142 = arith.mulf %141, %140 : vector<8x64xf32>
    %143 = math.tanh %142 : vector<8x64xf32>
    %cst_54 = arith.constant 1.000000e+00 : f32
    %144 = vector.broadcast %cst_54 : f32 to vector<8x64xf32>
    %145 = arith.addf %144, %143 : vector<8x64xf32>
    %146 = arith.mulf %135, %145 : vector<8x64xf32>
    %147 = arith.truncf %146 : vector<8x64xf32> to vector<8x64xbf16>
    %c0_55 = arith.constant 0 : index
    %c0_56 = arith.constant 0 : index
    %148 = vector.load %arg11[%c0_55, %c0_56] : memref<64x32xbf16, #tpu.memory_space<vmem>>, vector<64x32xbf16>
    %cst_57 = arith.constant dense<0.000000e+00> : vector<8x32xf32>
    %149 = tpu.matmul %147, %148, %cst_57 {dimension_numbers = #tpu.dot_dimension_numbers<[1], [0], [0], [1], [0, 0, 1, 1], [], []>} : vector<8x64xbf16>, vector<64x32xbf16>, vector<8x32xf32> -> vector<8x32xf32>
    %c0_58 = arith.constant 0 : index
    %c0_59 = arith.constant 0 : index
    %150 = vector.load %arg12[%c0_58, %c0_59] : memref<1x32xf32, #tpu.memory_space<vmem>>, vector<1x32xf32>
    %151 = vector.broadcast %150 : vector<1x32xf32> to vector<8x32xf32>
    %152 = arith.addf %149, %151 : vector<8x32xf32>
    %153 = arith.addf %152, %127 : vector<8x32xf32>
    %c0_60 = arith.constant 0 : index
    %c0_61 = arith.constant 0 : index
    %154 = vector.load %arg13[%c0_60, %c0_61] : memref<1x32xf32, #tpu.memory_space<vmem>>, vector<1x32xf32>
    %c0_62 = arith.constant 0 : index
    %c0_63 = arith.constant 0 : index
    %155 = vector.load %arg14[%c0_62, %c0_63] : memref<1x32xf32, #tpu.memory_space<vmem>>, vector<1x32xf32>
    %cst_64 = arith.constant dense<0.000000e+00> : vector<8xf32>
    %156 = vector.multi_reduction <add>, %153, %cst_64 [1] : vector<8x32xf32> to vector<8xf32>
    %157 = vector.shape_cast %156 : vector<8xf32> to vector<8x1xf32>
    %cst_65 = arith.constant 3.200000e+01 : f32
    %158 = vector.broadcast %cst_65 : f32 to vector<8x1xf32>
    %159 = arith.divf %157, %158 : vector<8x1xf32>
    %160 = vector.broadcast %159 : vector<8x1xf32> to vector<8x32xf32>
    %161 = arith.subf %153, %160 : vector<8x32xf32>
    %162 = arith.mulf %161, %161 : vector<8x32xf32>
    %cst_66 = arith.constant dense<0.000000e+00> : vector<8xf32>
    %163 = vector.multi_reduction <add>, %162, %cst_66 [1] : vector<8x32xf32> to vector<8xf32>
    %164 = vector.shape_cast %163 : vector<8xf32> to vector<8x1xf32>
    %cst_67 = arith.constant 3.200000e+01 : f32
    %165 = vector.broadcast %cst_67 : f32 to vector<8x1xf32>
    %166 = arith.divf %164, %165 : vector<8x1xf32>
    %cst_68 = arith.constant 9.99999996E-13 : f32
    %167 = vector.broadcast %cst_68 : f32 to vector<8x1xf32>
    %168 = arith.addf %166, %167 : vector<8x1xf32>
    %169 = math.rsqrt %168 : vector<8x1xf32>
    %170 = vector.broadcast %169 : vector<8x1xf32> to vector<8x32xf32>
    %171 = arith.mulf %161, %170 : vector<8x32xf32>
    %172 = vector.broadcast %154 : vector<1x32xf32> to vector<8x32xf32>
    %173 = arith.mulf %171, %172 : vector<8x32xf32>
    %174 = vector.broadcast %155 : vector<1x32xf32> to vector<8x32xf32>
    %175 = arith.addf %173, %174 : vector<8x32xf32>
    %c0_69 = arith.constant 0 : index
    %c0_70 = arith.constant 0 : index
    %c0_71 = arith.constant 0 : index
    %176 = vector.load %arg15[%c0_69, %c0_70, %c0_71] : memref<1x8x32xf32, #tpu.memory_space<vmem>>, vector<1x8x32xf32>
    %177 = vector.shape_cast %176 : vector<1x8x32xf32> to vector<8x32xf32>
    %178 = vector.shape_cast %175 : vector<8x32xf32> to vector<1x8x32xf32>
    tpu.vector_store %arg15[%c0_69, %c0_70, %c0_71], %178 {strides = array<i32>} : memref<1x8x32xf32, #tpu.memory_space<vmem>>, vector<1x8x32xf32>,
    return
  }
  func.func @transform_0(%arg0: i32) -> (i32, i32, i32) {
    %c0_i32 = arith.constant 0 : i32
    %c0_i32_0 = arith.constant 0 : i32
    %c0_i32_1 = arith.constant 0 : i32
    return %arg0, %c0_i32, %c0_i32_0 : i32, i32, i32
  }
  func.func @transform_1(%arg0: i32) -> (i32, i32, i32) {
    %c0_i32 = arith.constant 0 : i32
    %c0_i32_0 = arith.constant 0 : i32
    %c0_i32_1 = arith.constant 0 : i32
    return %arg0, %c0_i32, %c0_i32_0 : i32, i32, i32
  }
  func.func @transform_2(%arg0: i32) -> (i32, i32) {
    %c0_i32 = arith.constant 0 : i32
    %c0_i32_0 = arith.constant 0 : i32
    %c0_i32_1 = arith.constant 0 : i32
    return %c0_i32, %c0_i32_0 : i32, i32
  }
  func.func @transform_3(%arg0: i32) -> (i32, i32) {
    %c0_i32 = arith.constant 0 : i32
    %c0_i32_0 = arith.constant 0 : i32
    %c0_i32_1 = arith.constant 0 : i32
    return %c0_i32, %c0_i32_0 : i32, i32
  }
  func.func @transform_4(%arg0: i32) -> (i32, i32) {
    %c0_i32 = arith.constant 0 : i32
    %c0_i32_0 = arith.constant 0 : i32
    %c0_i32_1 = arith.constant 0 : i32
    return %c0_i32, %c0_i32_0 : i32, i32
  }
  func.func @transform_5(%arg0: i32) -> (i32, i32) {
    %c0_i32 = arith.constant 0 : i32
    %c0_i32_0 = arith.constant 0 : i32
    %c0_i32_1 = arith.constant 0 : i32
    return %c0_i32, %c0_i32_0 : i32, i32
  }
  func.func @transform_6(%arg0: i32) -> (i32, i32) {
    %c0_i32 = arith.constant 0 : i32
    %c0_i32_0 = arith.constant 0 : i32
    %c0_i32_1 = arith.constant 0 : i32
    return %c0_i32, %c0_i32_0 : i32, i32
  }
  func.func @transform_7(%arg0: i32) -> (i32, i32) {
    %c0_i32 = arith.constant 0 : i32
    %c0_i32_0 = arith.constant 0 : i32
    %c0_i32_1 = arith.constant 0 : i32
    return %c0_i32, %c0_i32_0 : i32, i32
  }
  func.func @transform_8(%arg0: i32) -> (i32, i32) {
    %c0_i32 = arith.constant 0 : i32
    %c0_i32_0 = arith.constant 0 : i32
    %c0_i32_1 = arith.constant 0 : i32
    return %c0_i32, %c0_i32_0 : i32, i32
  }
  func.func @transform_9(%arg0: i32) -> (i32, i32) {
    %c0_i32 = arith.constant 0 : i32
    %c0_i32_0 = arith.constant 0 : i32
    %c0_i32_1 = arith.constant 0 : i32
    return %c0_i32, %c0_i32_0 : i32, i32
  }
  func.func @transform_10(%arg0: i32) -> (i32, i32) {
    %c0_i32 = arith.constant 0 : i32
    %c0_i32_0 = arith.constant 0 : i32
    %c0_i32_1 = arith.constant 0 : i32
    return %c0_i32, %c0_i32_0 : i32, i32
  }
  func.func @transform_11(%arg0: i32) -> (i32, i32) {
    %c0_i32 = arith.constant 0 : i32
    %c0_i32_0 = arith.constant 0 : i32
    %c0_i32_1 = arith.constant 0 : i32
    return %c0_i32, %c0_i32_0 : i32, i32
  }
  func.func @transform_12(%arg0: i32) -> (i32, i32) {
    %c0_i32 = arith.constant 0 : i32
    %c0_i32_0 = arith.constant 0 : i32
    %c0_i32_1 = arith.constant 0 : i32
    return %c0_i32, %c0_i32_0 : i32, i32
  }
  func.func @transform_13(%arg0: i32) -> (i32, i32) {
    %c0_i32 = arith.constant 0 : i32
    %c0_i32_0 = arith.constant 0 : i32
    %c0_i32_1 = arith.constant 0 : i32
    return %c0_i32, %c0_i32_0 : i32, i32
  }
  func.func @transform_14(%arg0: i32) -> (i32, i32, i32) {
    %c0_i32 = arith.constant 0 : i32
    %c0_i32_0 = arith.constant 0 : i32
    %c0_i32_1 = arith.constant 0 : i32
    return %arg0, %c0_i32, %c0_i32_0 : i32, i32, i32
  }
}

</mosaic_0001>

<bundles_post_ra>
// kernel: tpu_custom_call.1
= control target key start
LH: loop header
LB: loop body
LE: loop exit
PB: predicated region body
PF: predicated region fallthrough
CT: control target
= control target key end

     0   :  { %s1776_s0 = inlined_call_operand.vmem [shape: f32[2,8,32], index: 0, kind: input, shape index: {}]   ;;  %s1777_s1 = inlined_call_operand.hbm [shape: f32[2,1,8], index: 1, kind: input, shape index: {}]   ;;  %s1778_s2 = inlined_call_operand.vmem [shape: bf16[32,96], index: 2, kind: input, shape index: {}]   ;;  %s1779_s3 = inlined_call_operand.vmem [shape: f32[1,96], index: 3, kind: input, shape index: {}]   ;;  %s1780_s4 = inlined_call_operand.vmem [shape: bf16[32,32], index: 4, kind: input, shape index: {}]   ;;  %s1781_s5 = inlined_call_operand.vmem [shape: f32[1,32], index: 5, kind: input, shape index: {}]   ;;  %s1782_s6 = inlined_call_operand.vmem [shape: f32[1,32], index: 6, kind: input, shape index: {}]   ;;  %s1783_s7 = inlined_call_operand.vmem [shape: f32[1,32], index: 7, kind: input, shape index: {}]   ;;  %s1784_s8 = inlined_call_operand.hbm [shape: bf16[32,64], index: 8, kind: input, shape index: {}]   ;;  %s1785_s9 = inlined_call_operand.vmem [shape: f32[1,64], index: 9, kind: input, shape index: {}]   ;;  %s1786_s10 = inlined_call_operand.vmem [shape: bf16[64,32], index: 10, kind: input, shape index: {}]   ;;  %s1787_s11 = inlined_call_operand.vmem [shape: f32[1,32], index: 11, kind: input, shape index: {}]   ;;  %s1788_s12 = inlined_call_operand.vmem [shape: f32[1,32], index: 12, kind: input, shape index: {}]   ;;  %s1789_s13 = inlined_call_operand.vmem [shape: f32[1,32], index: 13, kind: input, shape index: {}]   ;;  %s1790_s14 = inlined_call_operand.hbm [shape: f32[2,8,32], index: 14, kind: output, shape index: {}]  }
   0x1   :  { %1796 = sst [smem:[#allocation17_spill]] %s1784_s8 }
   0x2   :  { %1797 = sst [smem:[#allocation18_spill]] %s1789_s13 }
   0x3   :  { %19 = vsyncpa [#allocation4], 0 }
   0x4   :  { %21 = vsyncpa [#allocation4 + $0x1], 0 }
   0x5   :  { %22 = vsyncpa [#allocation7], 0 }
   0x6   :  { %23 = vsyncpa [#allocation5], 0 }
   0x7   :  { %25 = vsyncpa [#allocation5 + $0x1], 0  ;;  %s1526_s29 = smov 0   ;;  %s1528_s30 = smov 0  }
   0x8   :  { %s1530_s15 = smov 0   ;;  %s1532_s16 = smov 0  }
   0x9 LB: > { %1798 = sst [smem:[#allocation12_spill]] %s1419_s29  ;;  %s1550_s20 = sadd.s32 4294967295, %s1431_s16   ;;  %s1431_s16 = sphi %s1532_s16, %s1813_s16   ;;  %s1427_s15 = sphi %s1530_s15, %s1815_s15   ;;  %s1423_s30 = sphi %s1528_s30, %s1817_s30   ;;  %s1419_s29 = sphi %s1526_s29, %s1816_s29  }
   0xa   : > { %1799 = sst [smem:[#allocation13_spill]] %s1427_s15  ;;  %p1121_p0 = scmp.ge.s32.totalorder %s1431_s16, 1 }
   0xb   : > { %1800 = sst [smem:[#allocation14_spill]] %s1431_s16  ;;  %p78_p1 = scmp.eq.s32.totalorder %s1550_s20, 0 }
   0xc   : > { %s1801_s8 = sld [smem:[#allocation17_spill]]  ;;  %p366_p2 = scmp.lt.s32.totalorder %s1431_s16, 3 }
   0xd   : > { %s1433_s22 = smov [#allocation6]   ;;  %s1434_s24 = smov 64  }
   0xe   : > { %p1555_p3 = pnand %p1121_p0, %p366_p2  ;;  %s397_s23 = sshll.u32 %s1433_s22, 4  ;;  %s398_s23 = int_to_ptr.vmem [resolvable:$true] %s397_s23 }
   0xf   : > { %s1435_s25 = smov 4   ;;  %s1120_s26 = sadd.s32 4294967294, %s1431_s16  }
  0x10   : > { %p1202_p4 = pneg %p1555_p3  ;;  %s1566_s27 = sadd.s32 1, %s1431_s16  }
  0x11   : > { %1803 = sst [smem:[#allocation15_spill]] %s1566_s27  ;;  %s64_s28 = sadd.s32 1, %s1427_s15 }
  0x12   : > { %s395_s19 = sshll.u32 %s1801_s8, 4  ;;  %p1203_p6 = pnand %p1202_p4, %p78_p1  ;;  %s396_s19 = int_to_ptr.hbm [resolvable:$true] %s395_s19 }
  0x13   : > { %s61_s17 = ssub.s32 %s1431_s16, %s1566_s27  ;;  %p71_p7 = scmp.ne.s32.totalorder %s1427_s15, %s1423_s30 }
  0x14   : > { %1205 = dma.hbm_to_vmem [thread:$0]  (!%p1203_p6), %s396_s19, 256, %s398_s23, [#allocation7], %s1434_s24, %s1434_s24, %s1435_s25  }
  0x15   : > { %p62_p8 = scmp.eq.s32.totalorder %s61_s17, 0  ;;  %p72_p9 = scmp.eq.s32.totalorder %s1431_s16, 0 }
  0x16   : > { %p77_p10 = scmp.ne.s32.totalorder %s1423_s30, %s1419_s29  ;;  %p353_p11 = scmp.eq.s32.totalorder %s1550_s20, 1 }
  0x17   : > { %s1578_s18 = scalar_select %p62_p8, %s1427_s15, %s64_s28  }
  0x18   : > { %p1582_p12 = por %p78_p1, %p77_p10  ;;  %p1586_p13 = por %p353_p11, %p71_p7 }
  0x19   : > { %1804 = sst [smem:[#allocation16_spill]] %s1578_s18  ;;  %p359_p0 = scmp.eq.s32.totalorder %s1120_s26, 1 }
  0x1a   : > { %p73_p2 = por %p72_p9, %p71_p7  ;;  %s433_s23 = sand.u32 1, %s1427_s15  }
  0x1b   : > { %p1591_p4 = por %p359_p0, %p77_p10  ;;  %p1215_p6 = scmp.lt.s32.totalorder %s1431_s16, 2 }
  0x1c   : > { %s439_s17 = scalar_lea.hbm %s1777_s1, %s1431_s16  ;;  %s436_s18 = scalar_lea.vmem [#allocation3], %s433_s23 }
  0x1d   : > { %s441_s8 = sshll.u32 %s439_s17, 4  ;;  %s443_s27 = sshll.u32 %s436_s18, 4  ;;  %s442_s8 = int_to_ptr.hbm [resolvable:$true] %s441_s8  ;;  %s444_s27 = int_to_ptr.vmem [resolvable:$true] %s443_s27 }
  0x1e   : > { %p1600_p8 = pnand %p1215_p6, %p73_p2  ;;  %s434_s26 = scalar_lea.sflag [#allocation4], %s433_s23 }
  0x1f   : > { %s1331_s15 = sshra.s32 %s442_s8, 4  ;;  %s1338_s18 = scalar_lea.hbm %s1777_s1, 2  ;;  %s1332_s15 = int_to_ptr.hbm [resolvable:$true] %s1331_s15 }
  0x20   : > { %s1333_s13 = scalar_lea.hbm %s1332_s15, 1  ;;  %p1335_p9 = pneg %p1600_p8 }
  0x21   : > { %p1334_p7 = scmp.ne.s32.totalorder %s1332_s15, %s1333_s13  ;;  %p1339_p0 = scmp.lt.s32.totalorder %s1332_s15, %s1777_s1 }
  0x22   : > { %p1340_p2 = scmp.lt.s32.totalorder %s1338_s18, %s1333_s13 }
  0x23   : > { %p1336_p10 = pnand %p1335_p9, %p1334_p7 }
  0x24   : > { %p1341_p6 = por %p1340_p2, %p1339_p0 }
  0x25   : > { %p1337_p11 = pneg %p1336_p10 }
  0x27   : > { %p1342_p5 = pnand %p1341_p6, %p1337_p11 }
  0x29   : > { %1345 = shalt.err (!%p1342_p5)
}
  0x2a   : > { %1209 = dma.hbm_to_vmem [thread:$0]  (!%p1600_p8), %s442_s8, 16, %s444_s27, %s434_s26  }
  0x2b   : > { %452 = sbr.rel (%p1555_p3) target bundleno = 1821 (0x71d), region = 76  ;;  %s1617_s23 = sand.u32 (!%p1555_p3), 1, %s1423_s30  }
  0x2c   : > { %s455_s25 = scalar_lea.sflag (!%p1555_p3), [#allocation4], %s1617_s23  ;;  %s457_s28 = scalar_lea.vmem (!%p1555_p3), [#allocation3], %s1617_s23 }
  0x30   : > { %1406 = dma.done.wait (%p1582_p12), %s455_s25, 16  }
  0x31   : > { %1408 = vsyncadd (%p1582_p12), %s455_s25, 4294967280 }
  0x32   : > { %1410 = dma.done.wait (%p78_p1), [#allocation7], 256  }
  0x33   : > { %1412 = vsyncadd (%p78_p1), [#allocation7], 4294967040  ;;  %p511_p3 = scmp.lt.s32.totalorder %s1550_s20, 1  ;;  %v1185_v0 = vld [vmem:[%s1778_s2 + $0x8] sm:$0xff]  ;;  %v1184_v1 = vld [vmem:[%s1778_s2] sm:$0xff]  ;;  %vm539_vm0 = vcmask 261120  }
  0x34   : > { %549 = vmatpush.bf16.msra.mxu0 %v1185_v0  ;;  %v1268_v4 = vld [vmem:[%s1779_s3] ss:$0 sm:$0xff]  ;;  %s1436_s25 = smov 104   ;;  %s1439_s29 = smov 80   ;;  %vm563_vm1 = vcmask 64512   ;;  %vm598_vm2 = vcmask 1043456  }
  0x35   : > { %s512_s8 = scalar_select %p511_p3, %s1550_s20, 1  ;;  %v1269_v24 = vld [vmem:[%s457_s28] ss:$0 sm:$0xff]  ;;  %vm678_vm3 = vcmask 130112   ;;  %vm740_vm4 = vcmask 195712   ;;  %vm802_vm5 = vcmask 261312  }
  0x36   : > { %s1440_s15 = smov 72   ;;  %s1442_s21 = smov 64   ;;  %vm965_vm10 = vcmask 523264  }
  0x37   : > { %s1127_s13 = sshll.u32 %s512_s8, 3  ;;  %s1437_s8 = smov 120  }
  0x38   : > { %s514_s16 = scalar_lea.vmem %s1776_s0, %s1127_s13  ;;  %550 = vmatpush.bf16.msra.mxu0 %v1184_v1  ;;  %s1438_s13 = smov 96  }
  0x39   : > { %v1640_v2 = vld [vmem:[%s514_s16] sm:$0xff]  ;;  %s1441_s16 = smov 88   ;;  %s1443_s27 = smov 112  }
  0x3a   : > { %v518_v3 = vpack.c.bf16 %v1640_v2, %v1640_v2  ;;  %s1444_s22 = smov 56   ;;  %s1445_s28 = smov 48  }
  0x3b   : > { %s1446_s26 = smov 40   ;;  %s1447_s18 = smov 8  }
  0x3c   : > { %1136 = vmatmul.msk.bf16.vlgmr.msra.gmra.mxu0 %vm539_vm0, %v518_v3  ;;  %s1448_s17 = smov 16  }
  0xb9   : > { %v552_v5 = vpop.f32.mrf.mxu0 }
  0xba   : > { %v553_v6 = vadd.f32 %v1268_v4, %v552_v5 }
  0xbc   : > { %v1648_v7 = vpack.c.bf16 %v553_v6, %v553_v6 }
  0xbe   : > { %742 = vrot.lane.b32.xlu2 %v1648_v7, %s1436_s25  ;;  %618 = vrot.lane.b32.xlu1 %v1648_v7, %s1437_s8  ;;  %s1449_s25 = smov 24  }
  0xbf   : > { %561 = vrot.lane.b32.xlu0 %v1648_v7, %s1438_s13 }
  0xc1   : > { %v554_v8 = vpop.f32.mrf.mxu0 }
  0xc6   : > { %682 = vrot.lane.b32.xlu2 %v1648_v7, %s1439_s29  ;;  %744 = vrot.lane.b32.xlu1 %v1648_v7, %s1440_s15 }
  0xc7   : > { %620 = vrot.lane.b32.xlu0 %v1648_v7, %s1441_s16 }
  0xce   : > { %593 = vrot.lane.b32.xlu2 %v1648_v7, %s1442_s21  ;;  %s1809_s21 = sld [smem:[#allocation18_spill]] }
  0xcf   : > { %680 = vrot.lane.b32.xlu0 %v1648_v7, %s1443_s27 }
  0xd6   : > { %651 = vrot.lane.b32.xlu2 %v1648_v7, %s1444_s22 }
 0x118   : > { %v743_v9 = vpop.permute.xlu2 %742 }
 0x120   : > { %v683_v10 = vpop.permute.xlu2 %682 }
 0x121   : > { %v688_v11 = vsel %vm563_vm1, %v683_v10, 0 }
 0x122   : > { %697 = vmatpush.bf16.xpose.msrb.mxu0 %v688_v11 }
 0x128   : > { %v594_v12 = vpop.permute.xlu2 %593 }
 0x129   : > { %v600_v13 = vsel %vm598_vm2, %v594_v12, 0 }
 0x12a   : > { %609 = vmatpush.bf16.msra.mxu2 %v600_v13 }
 0x130   : > { %v652_v14 = vpop.permute.xlu2 %651  ;;  %v619_v15 = vpop.permute.xlu1 %618 }
 0x131   : > { %v562_v16 = vpop.permute.xlu0 %561  ;;  %v657_v17 = vsel %vm598_vm2, %v652_v14, 0 }
 0x132   : > { %v568_v18 = vsel %vm563_vm1, %v562_v16, 0  ;;  %666 = vmatpush.bf16.msrb.mxu2 %v657_v17 }
 0x133   : > { %577 = vmatpush.bf16.xpose.msra.mxu1 %v568_v18 }
 0x138   : > { %v745_v19 = vpop.permute.xlu1 %744 }
 0x139   : > { %v621_v20 = vpop.permute.xlu0 %620  ;;  %v750_v21 = vsel %vm563_vm1, %v745_v19, 0 }
 0x13a   : > { %1137 = vmatmul.msk.bf16.vlgmr.msra.gmra.mxu1 %vm563_vm1, %v1648_v7  ;;  %v626_v22 = vsel %vm563_vm1, %v621_v20, 0 }
 0x13b   : > { %635 = vmatpush.bf16.xpose.msra.mxu3 %v626_v22 }
 0x141   : > { %v681_v23 = vpop.permute.xlu0 %680 }
 0x142   : > { %1139 = vmatmul.msk.bf16.vlgmr.msra.gmra.mxu3 %vm563_vm1, %v619_v15  ;;  %1141 = vmatmul.msk.bf16.vlgmr.msrb.gmra.mxu0 %vm563_vm1, %v681_v23 }
 0x143   : > { %759 = vmatpush.bf16.xpose.msrb.mxu3 %v750_v21 }
 0x152   : > { %1143 = vmatmul.msk.bf16.vlgmr.msrb.gmra.mxu3 %vm563_vm1, %v743_v9 }
 0x1b7   : > { %v579_v25 = vpop.f32.mrf.mxu1 }
 0x1b8   : > { %v580_v26 = vadd.f32 %v1269_v24, %v579_v25 }
 0x1ba   : > { %v583_v27 = vsel %vm563_vm1, %v580_v26, -inf }
 0x1bb   : > { %584 = vmax.xlane.f32.xlu1 %v583_v27  ;;  %v1186_v27 = vld [vmem:[%s1780_s4] sm:$0xff] }
 0x1bf   : > { %v581_v28 = vpop.f32.mrf.mxu1  ;;  %v699_v29 = vpop.f32.mrf.mxu0 }
 0x1c0   : > { %v700_v30 = vadd.f32 %v1269_v24, %v699_v29 }
 0x1c2   : > { %v703_v31 = vsel %vm563_vm1, %v700_v30, -inf }
 0x1c3   : > { %704 = vmax.xlane.f32.xlu1 %v703_v31 }
 0x1c5   : > { %v637_v32 = vpop.f32.mrf.mxu3 }
 0x1c6   : > { %v638_v33 = vadd.f32 %v1269_v24, %v637_v32 }
 0x1c7   : > { %v701_v34 = vpop.f32.mrf.mxu0 }
 0x1c8   : > { %v641_v35 = vsel %vm563_vm1, %v638_v33, -inf }
 0x1c9   : > { %642 = vmax.xlane.f32.xlu0 %v641_v35 }
 0x1cd   : > { %v639_v36 = vpop.f32.mrf.mxu3 }
 0x1d5   : > { %v761_v37 = vpop.f32.mrf.mxu3 }
 0x1d6   : > { %v762_v38 = vadd.f32 %v1269_v24, %v761_v37 }
 0x1d8   : > { %v765_v39 = vsel %vm563_vm1, %v762_v38, -inf }
 0x1d9   : > { %766 = vmax.xlane.f32.xlu2 %v765_v39  ;;  %v1450_v39 = vmov 32.0  }
 0x1dc   : > { %713 = vrot.lane.b32.xlu1 %v1648_v7, %s1445_s28  ;;  %s1017_s28 = scalar_lea.sflag [#allocation5], %s1617_s23 }
 0x1dd   : > { %v763_v40 = vpop.f32.mrf.mxu3  ;;  %775 = vrot.lane.b32.xlu0 %v1648_v7, %s1446_s26  ;;  %s1126_s26 = sshll.u32 %s1617_s23, 3 }
 0x22e   : > { %v585_v41 = vpop.xlane.xlu1 %584 }
 0x22f   : > { %v586_v42 = vsub.f32 %v580_v26, %v585_v41  ;;  %v1187_v26 = vld [vmem:[%s1780_s4 + $0x8] sm:$0xff] }
 0x230   : > { %835 = vmatpush.bf16.msra.mxu0 %v1187_v26 }
 0x231   : > { %v587_v43 = vmul.f32 1.442695, %v586_v42 }
 0x233   : > { %1277 = vpow2.f32 %v587_v43 }
 0x234   : > { %836 = vmatpush.bf16.msra.mxu0 %v1186_v27 }
 0x236   : > { %v705_v46 = vpop.xlane.xlu1 %704 }
 0x237   : > { %v706_v49 = vsub.f32 %v700_v30, %v705_v46 }
 0x239   : > { %v1278_v44 = vpop.eup %1277  ;;  %v707_v51 = vmul.f32 1.442695, %v706_v49 }
 0x23a   : > { %v592_v45 = vpack.c.bf16 %v1278_v44, %v1278_v44  ;;  %v589_v4 = vsel %vm563_vm1, %v1278_v44, 0.0 }
 0x23c   : > { %1138 = vmatmul.msk.bf16.vlgmr.msra.gmra.mxu2 %vm563_vm1, %v592_v45  ;;  %v643_v47 = vpop.xlane.xlu0 %642 }
 0x23d   : > { %v644_v48 = vsub.f32 %v638_v33, %v643_v47  ;;  %v1270_v33 = vld [vmem:[%s1781_s5] ss:$0 sm:$0xff] }
 0x23f   : > { %v645_v50 = vmul.f32 1.442695, %v644_v48 }
 0x241   : > { %1279 = vpow2.f32 %v645_v50  ;;  %v1189_v50 = vld [vmem:[#allocation6 + $0x8] sm:$0xff] }
 0x242   : > { %1281 = vpow2.f32 %v707_v51  ;;  %v1188_v51 = vld [vmem:[#allocation6] sm:$0xff] }
 0x247   : > { %v1280_v52 = vpop.eup %1279 }
 0x248   : > { %v647_v53 = vsel %vm563_vm1, %v1280_v52, 0.0  ;;  %v650_v54 = vpack.c.bf16 %v1280_v52, %v1280_v52  ;;  %v1282_v56 = vpop.eup %1281 }
 0x249   : > { %648 = vadd.xlane.f32.xlu2 %v647_v53  ;;  %v709_v63 = vsel %vm563_vm1, %v1282_v56, 0.0  ;;  %v712_v0 = vpack.c.bf16 %v1282_v56, %v1282_v56 }
 0x24c   : > { %v767_v55 = vpop.xlane.xlu2 %766  ;;  %1140 = vmatmul.msk.bf16.vlgmr.msrb.gmra.mxu2 %vm563_vm1, %v650_v54 }
 0x24d   : > { %v768_v57 = vsub.f32 %v762_v38, %v767_v55 }
 0x24e   : > { %v714_v58 = vpop.permute.xlu1 %713 }
 0x24f   : > { %v769_v59 = vmul.f32 1.442695, %v768_v57  ;;  %v776_v60 = vpop.permute.xlu0 %775  ;;  %v719_v61 = vsel %vm598_vm2, %v714_v58, 0 }
 0x250   : > { %v781_v62 = vsel %vm598_vm2, %v776_v60, 0  ;;  %728 = vmatpush.bf16.msrb.mxu1 %v719_v61  ;;  %v1271_v61 = vld [vmem:[%s1782_s6] ss:$0 sm:$0xff] }
 0x251   : > { %1283 = vpow2.f32 %v769_v59  ;;  %710 = vadd.xlane.f32.xlu2 %v709_v63  ;;  %790 = vmatpush.bf16.msra.mxu2 %v781_v62  ;;  %v1272_v63 = vld [vmem:[%s1783_s7] ss:$0 sm:$0xff] }
 0x253   : > { %1142 = vmatmul.msk.bf16.vlgmr.msrb.gmra.mxu1 %vm563_vm1, %v712_v0 }
 0x254   : > { %912 = vmatpush.bf16.msra.mxu1 %v1189_v50 }
 0x257   : > { %v1284_v1 = vpop.eup %1283 }
 0x258   : > { %v771_v3 = vsel %vm563_vm1, %v1284_v1, 0.0  ;;  %v774_v5 = vpack.c.bf16 %v1284_v1, %v1284_v1  ;;  %913 = vmatpush.bf16.msra.mxu1 %v1188_v51 }
 0x259   : > { %772 = vadd.xlane.f32.xlu0 %v771_v3  ;;  %590 = vadd.xlane.f32.xlu2 %v589_v4 }
 0x25c   : > { %1144 = vmatmul.msk.bf16.vlgmr.msra.gmra.mxu2 %vm563_vm1, %v774_v5  ;;  %v1193_v5 = vld [vmem:[%s1786_s10 + $0x18] sm:$0xff] }
 0x25d   : > { %973 = vmatpush.bf16.msra.mxu3 %v1193_v5 }
 0x2bc   : > { %v649_v6 = vpop.xlane.xlu2 %648 }
 0x2bd   : > { %1285 = vrcp.f32 %v649_v6  ;;  %v1192_v6 = vld [vmem:[%s1786_s10 + $0x10] sm:$0xff] }
 0x2be   : > { %974 = vmatpush.bf16.msra.mxu3 %v1192_v6 }
 0x2bf   : > { %v611_v7 = vpop.f32.mrf.mxu2 }
 0x2c3   : > { %v1286_v11 = vpop.eup %1285 }
 0x2c4   : > { %v711_v8 = vpop.xlane.xlu2 %710 }
 0x2c5   : > { %1287 = vrcp.f32 %v711_v8  ;;  %v1190_v8 = vld [vmem:[%s1786_s10] sm:$0xff] }
 0x2c7   : > { %v613_v9 = vpop.f32.mrf.mxu2 }
 0x2c8   : > { %v1273_v9 = vld [vmem:[%s1785_s9] ss:$0 sm:$0xff] }
 0x2cb   : > { %v1288_v13 = vpop.eup %1287 }
 0x2cc   : > { %v591_v10 = vpop.xlane.xlu2 %590  ;;  %v773_v19 = vpop.xlane.xlu0 %772 }
 0x2cd   : > { %1289 = vrcp.f32 %v591_v10 }
 0x2ce   : > { %1291 = vrcp.f32 %v773_v19 }
 0x2cf   : > { %v668_v12 = vpop.f32.mrf.mxu2  ;;  %1293 = vrcp.f32 %v1450_v39 }
 0x2d0   : > { %v673_v14 = vmul.f32 %v1286_v11, %v668_v12  ;;  %v730_v15 = vpop.f32.mrf.mxu1 }
 0x2d1   : > { %v735_v16 = vmul.f32 %v1288_v13, %v730_v15 }
 0x2d2   : > { %675 = vrot.lane.b32.xlu1 %v673_v14, %s1447_s18  ;;  %s1181_s18 = sshll.u32 %s1550_s20, 3  ;;  %s510_s20 = scalar_lea.vmem [#allocation8], %s1126_s26 }
 0x2d3   : > { %v1290_v17 = vpop.eup %1289  ;;  %737 = vrot.lane.b32.xlu2 %v735_v16, %s1448_s17  ;;  %s1027_s29 = scalar_lea.hbm %s1790_s14, %s1181_s18  ;;  %s1029_s27 = sshll.u32 %s510_s20, 4  ;;  %s1030_s27 = int_to_ptr.vmem [resolvable:$true] %s1029_s27 }
 0x2d4   : > { %v616_v18 = vmul.f32 %v1290_v17, %v611_v7  ;;  %v1292_v22 = vpop.eup %1291  ;;  %v1191_v7 = vld [vmem:[%s1786_s10 + $0x8] sm:$0xff]  ;;  %s1031_s22 = sshll.u32 %s1027_s29, 4  ;;  %s1381_s26 = scalar_lea.hbm %s1790_s14, 16  ;;  %s1032_s22 = int_to_ptr.hbm [resolvable:$true] %s1031_s22 }
 0x2d5   : > { %v1294_v40 = vpop.eup %1293  ;;  %975 = vmatpush.bf16.msra.mxu3 %v1191_v7  ;;  %s1375_s17 = sshra.s32 %s1032_s22, 4  ;;  %s1376_s17 = int_to_ptr.hbm [resolvable:$true] %s1375_s17 }
 0x2d6   : > { %617 = vst.msk [vmem:[#allocation2] sm:$0xff] %vm563_vm1, %v616_v18  ;;  %v849_v41 = vmul.f32 32.0, %v1294_v40  ;;  %vm853_vm6 = vweird.f32 %v1294_v40  ;;  %s1377_s18 = scalar_lea.hbm %s1376_s17, 8  ;;  %p1382_p8 = scmp.lt.s32.totalorder %s1376_s17, %s1790_s14 }
 0x2d7   : > { %v670_v20 = vpop.f32.mrf.mxu2  ;;  %p1378_p1 = scmp.ne.s32.totalorder %s1376_s17, %s1377_s18  ;;  %p1383_p7 = scmp.lt.s32.totalorder %s1381_s26, %s1377_s18 }
 0x2d8   : > { %v732_v21 = vpop.f32.mrf.mxu1  ;;  %v850_v42 = vsub.f32 1.0, %v849_v41 }
 0x2d9   : > { %976 = vmatpush.bf16.msra.mxu3 %v1190_v8  ;;  %p1379_p5 = pnand %p1378_p1, %p1586_p13  ;;  %p1384_p9 = por %p1383_p7, %p1382_p8 }
 0x2da   : > { %v851_v43 = vmul.f32 %v1294_v40, %v850_v42 }
 0x2db   : > { %p1380_p12 = pneg %p1379_p5 }
 0x2dc   : > { %v852_v44 = vadd.f32 %v1294_v40, %v851_v43  ;;  %v1275_v43 = vld [vmem:[%s1788_s12] ss:$0 sm:$0xff] }
 0x2dd   : > { %p1385_p10 = pnand %p1384_p9, %p1380_p12 }
 0x2de   : > { %v1701_v45 = vsel %vm853_vm6, %v1294_v40, %v852_v44 }
 0x2df   : > { %v792_v23 = vpop.f32.mrf.mxu2 }
 0x2e0   : > { %v797_v24 = vmul.f32 %v1292_v22, %v792_v23  ;;  %v1274_v23 = vld [vmem:[%s1787_s11] ss:$0 sm:$0xff] }
 0x2e2   : > { %799 = vrot.lane.b32.xlu1 %v797_v24, %s1449_s25 }
 0x2e7   : > { %v794_v25 = vpop.f32.mrf.mxu2 }
 0x32d   : > { %v738_v29 = vpop.permute.xlu2 %737 }
 0x344   : > { %v676_v28 = vpop.permute.xlu1 %675 }
 0x345   : > { %679 = vst.msk [vmem:[#allocation2] sm:$0xff] %vm678_vm3, %v676_v28 }
 0x346   : > { %741 = vst.msk [vmem:[#allocation2] sm:$0xff] %vm740_vm4, %v738_v29 }
 0x354   : > { %v800_v30 = vpop.permute.xlu1 %799 }
 0x355   : > { %803 = vst.msk [vmem:[#allocation2] sm:$0xff] %vm802_vm5, %v800_v30 }
 0x35c   : > { %v804_v31 = vld [vmem:[#allocation2] sm:$0xff] }
 0x35d   : > { %v805_v32 = vpack.c.bf16 %v804_v31, %v804_v31 }
 0x35f   : > { %1153 = vmatmul.msk.bf16.vlgmr.msra.gmra.mxu0 %vm539_vm0, %v805_v32 }
 0x3dc   : > { %v838_v34 = vpop.f32.mrf.mxu0 }
 0x3dd   : > { %v839_v35 = vadd.f32 %v1270_v33, %v838_v34 }
 0x3df   : > { %v842_v36 = vadd.f32 %v839_v35, %v1640_v2 }
 0x3e1   : > { %v845_v37 = vsel %vm539_vm0, %v842_v36, 0.0 }
 0x3e2   : > { %846 = vadd.xlane.f32.xlu1 %v845_v37 }
 0x3e4   : > { %v840_v38 = vpop.f32.mrf.mxu0 }
 0x455   : > { %v847_v46 = vpop.xlane.xlu1 %846 }
 0x456   : > { %v855_v47 = vmul.f32 %v1701_v45, %v847_v46  ;;  %v1276_v46 = vld [vmem:[%s1809_s21] ss:$0 sm:$0xff] }
 0x458   : > { %v856_v48 = vsub.f32 %v842_v36, %v855_v47 }
 0x45a   : > { %v857_v49 = vmul.f32 %v856_v48, %v856_v48 }
 0x45c   : > { %v858_v2 = vsel %vm539_vm0, %v857_v49, 0.0 }
 0x45d   : > { %859 = vadd.xlane.f32.xlu2 %v858_v2 }
 0x4d0   : > { %v860_v52 = vpop.xlane.xlu2 %859 }
 0x4d1   : > { %v861_v53 = vmul.f32 %v860_v52, %v1701_v45 }
 0x4d3   : > { %v862_v54 = vadd.f32 1e-12, %v861_v53 }
 0x4d5   : > { %1295 = vrsqrt.f32 %v862_v54  ;;  %vm869_vm8 = vweird.f32 %v862_v54 }
 0x4db   : > { %v1296_v55 = vpop.eup %1295 }
 0x4dc   : > { %v864_v56 = vmul.f32 %v1296_v55, %v862_v54  ;;  %vm870_vm7 = vweird.f32 %v1296_v55 }
 0x4dd   : > { %vm871_vm9 = vmor %vm869_vm8, %vm870_vm7 }
 0x4de   : > { %v865_v57 = vmul.f32 %v1296_v55, %v864_v56 }
 0x4e0   : > { %v866_v58 = vmul.f32 0.5, %v865_v57 }
 0x4e2   : > { %v867_v59 = vsub.f32 1.5, %v866_v58 }
 0x4e4   : > { %v868_v60 = vmul.f32 %v1296_v55, %v867_v59 }
 0x4e6   : > { %v872_v62 = vsel %vm871_vm9, %v1296_v55, %v868_v60 }
 0x4e7   : > { %v873_v0 = vmul.f32 %v872_v62, %v856_v48 }
 0x4e9   : > { %v877_v1 = vmul.f32 %v1271_v61, %v873_v0 }
 0x4eb   : > { %v881_v3 = vadd.f32 %v1272_v63, %v877_v1 }
 0x4ed   : > { %v882_v4 = vpack.c.bf16 %v881_v3, %v881_v3 }
 0x4ef   : > { %1162 = vmatmul.msk.bf16.vlgmr.msra.gmra.mxu1 %vm539_vm0, %v882_v4 }
 0x56c   : > { %v915_v10 = vpop.f32.mrf.mxu1 }
 0x56d   : > { %v916_v11 = vadd.f32 %v1273_v9, %v915_v10 }
 0x56f   : > { %v920_v12 = vmul.f32 0.044715, %v916_v11  ;;  %v919_v19 = vmul.f32 0.5, %v916_v11 }
 0x571   : > { %v921_v13 = vmul.f32 %v920_v12, %v916_v11 }
 0x573   : > { %v922_v14 = vmul.f32 %v921_v13, %v916_v11 }
 0x574   : > { %v917_v15 = vpop.f32.mrf.mxu1 }
 0x575   : > { %v923_v16 = vadd.f32 %v922_v14, %v916_v11 }
 0x577   : > { %v924_v17 = vmul.f32 0.7978846, %v923_v16 }
 0x579   : > { %1297 = vtanh.f32 %v924_v17 }
 0x57f   : > { %v1298_v18 = vpop.eup %1297 }
 0x580   : > { %v926_v20 = vadd.f32 1.0, %v1298_v18 }
 0x582   : > { %v927_v21 = vmul.f32 %v926_v20, %v919_v19 }
 0x584   : > { %v928_v22 = vpack.c.bf16 %v927_v21, %v927_v21 }
 0x586   : > { %1179 = vmatmul.msk.bf16.vlgmr.msra.gmra.mxu3 %vm965_vm10, %v928_v22 }
 0x609   : > { %v978_v24 = vpop.f32.mrf.mxu3 }
 0x60a   : > { %v979_v25 = vadd.f32 %v1274_v23, %v978_v24 }
 0x60c   : > { %v982_v26 = vadd.f32 %v979_v25, %v881_v3 }
 0x60e   : > { %v985_v27 = vsel %vm539_vm0, %v982_v26, 0.0 }
 0x60f   : > { %986 = vadd.xlane.f32.xlu0 %v985_v27 }
 0x611   : > { %v980_v28 = vpop.f32.mrf.mxu3 }
 0x682   : > { %v987_v29 = vpop.xlane.xlu0 %986 }
 0x683   : > { %v988_v30 = vmul.f32 %v987_v29, %v1701_v45 }
 0x685   : > { %v989_v31 = vsub.f32 %v982_v26, %v988_v30 }
 0x687   : > { %v990_v32 = vmul.f32 %v989_v31, %v989_v31 }
 0x689   : > { %v991_v33 = vsel %vm539_vm0, %v990_v32, 0.0 }
 0x68a   : > { %992 = vadd.xlane.f32.xlu0 %v991_v33 }
 0x6fd   : > { %v993_v34 = vpop.xlane.xlu0 %992 }
 0x6fe   : > { %v994_v35 = vmul.f32 %v993_v34, %v1701_v45 }
 0x700   : > { %v995_v36 = vadd.f32 1e-12, %v994_v35 }
 0x702   : > { %1299 = vrsqrt.f32 %v995_v36  ;;  %vm1002_vm12 = vweird.f32 %v995_v36 }
 0x708   : > { %v1300_v37 = vpop.eup %1299 }
 0x709   : > { %v997_v38 = vmul.f32 %v1300_v37, %v995_v36  ;;  %vm1003_vm11 = vweird.f32 %v1300_v37 }
 0x70a   : > { %vm1004_vm13 = vmor %vm1002_vm12, %vm1003_vm11 }
 0x70b   : > { %v998_v39 = vmul.f32 %v1300_v37, %v997_v38 }
 0x70d   : > { %v999_v40 = vmul.f32 0.5, %v998_v39 }
 0x70f   : > { %v1000_v41 = vsub.f32 1.5, %v999_v40 }
 0x711   : > { %v1001_v42 = vmul.f32 %v1300_v37, %v1000_v41 }
 0x713   : > { %v1005_v44 = vsel %vm1004_vm13, %v1300_v37, %v1001_v42 }
 0x714   : > { %v1006_v45 = vmul.f32 %v1005_v44, %v989_v31 }
 0x716   : > { %v1010_v47 = vmul.f32 %v1275_v43, %v1006_v45 }
 0x718   : > { %v1014_v48 = vadd.f32 %v1276_v46, %v1010_v47 }
 0x71a   : > { %1015 = vst.msk [vmem:[%s510_s20] sm:$0xff] %vm539_vm0, %v1014_v48 }
 0x71b   : > { %1388 = shalt.err (!%p1385_p10)
}
 0x71c   : > { %1200 = dma.vmem_to_hbm [thread:$0]  (%p1586_p13), %s1030_s27, 128, %s1032_s22, %s1017_s28  }
 0x71d PF: > { %s1810_s23 = sld [smem:[#allocation12_spill]] }
 0x71e   : > { %s1811_s15 = sld [smem:[#allocation14_spill]] }
 0x723   : > { %s1043_s16 = sand.u32 1, %s1810_s23  }
 0x724   : > { %p1812_p11 = scmp.ge.s32.totalorder %s1811_s15, 2  ;;  %s1044_s21 = scalar_lea.sflag [#allocation5], %s1043_s16 }
 0x726   : > { %p1211_p0 = pnand %p1812_p11, %p1591_p4 }
 0x728   : > { %p1212_p2 = pneg %p1211_p0 }
 0x72a   : > { %1414 = dma.done.wait (%p1212_p2), %s1044_s21, 128  }
 0x72b   : > { %1416 = vsyncadd (%p1212_p2), %s1044_s21, 4294967168  ;;  %s1813_s16 = sld [smem:[#allocation15_spill]]  ;;  %s1816_s29 = smov %s1423_s30 }
 0x72c   : > { %s1814_s20 = sld [smem:[#allocation13_spill]] }
 0x72d   : > { %s1815_s15 = sld [smem:[#allocation16_spill]] }
 0x731   : > { %p28_p6 = scmp.ge.s32.totalorder %s1813_s16, 4  }
 0x732   : > { %s1817_s30 = smov %s1814_s20 }
 0x733   :  { %30 = sbr.rel (!%p28_p6) target bundleno = 9 (0x9), region = 128 }
 0x738   :  { %1050 = vsyncpa [#allocation4], 1 }
 0x739   :  { %1052 = vsyncpa [#allocation4 + $0x1], 1 }
 0x73a   :  { %1053 = vsyncpa [#allocation7], 1 }
 0x73b   :  { %1054 = vsyncpa [#allocation5], 1 }
 0x73c   :  { %1056 = vsyncpa [#allocation5 + $0x1], 1 }

</bundles_post_ra>
